<compile_context>
chip_gen: v5e
topology: v5e:2x2
jax: 0.10.0
libtpu: 0.0.40
codegen_flags: <defaults>
</compile_context>

<pallas_src>
import functools

import jax
import jax.numpy as jnp
import numpy as np
from jax import lax
from jax.experimental import pallas as pl
from jax.experimental.pallas import tpu as pltpu


def _round_up(x, m):
    return (x + m - 1) // m * m


_COMPILER_PARAMS = pltpu.CompilerParams(
    dimension_semantics=("parallel",),
    vmem_limit_bytes=32 * 1024 * 1024,   # keep <= 32 MiB: safe on v7x (64 MiB/TC)
)


# ----------------------------- Pallas kernels ------------------------------ #

def _conv_kernel(a_ref, w_ref, shift_ref, o_ref, *, relu):
    """out = epilogue(A @ W + shift)   (f32 accumulate / epilogue)."""
    acc = jnp.dot(a_ref[...], w_ref[...], preferred_element_type=jnp.float32)
    acc = acc + shift_ref[...]
    if relu:
        acc = jnp.maximum(acc, 0.0)
    o_ref[...] = acc.astype(o_ref.dtype)


def _conv_res_kernel(a_ref, w_ref, shift_ref, res_ref, o_ref, *, relu):
    """out = epilogue(A @ W + shift + residual)   (f32 accumulate / epilogue)."""
    acc = jnp.dot(a_ref[...], w_ref[...], preferred_element_type=jnp.float32)
    acc = acc + shift_ref[...] + res_ref[...].astype(jnp.float32)
    if relu:
        acc = jnp.maximum(acc, 0.0)
    o_ref[...] = acc.astype(o_ref.dtype)


def _conv1_ds_kernel(a_ref, w_ref, shift_ref, o1_ref, id_ref):
    """One matmul emits [conv1 | downsample-identity] as two lane-dense outputs.

    Columns [0, Cp) of W are conv1 (+bn1), columns [Cp, 2Cp) are the fused
    1x1-stride downsample (+bn_ds).  ReLU only on the conv1 half.
    """
    acc = jnp.dot(a_ref[...], w_ref[...], preferred_element_type=jnp.float32)
    acc = acc + shift_ref[...]
    cp = o1_ref.shape[1]
    o1_ref[...] = jnp.maximum(acc[:, :cp], 0.0).astype(o1_ref.dtype)
    id_ref[...] = acc[:, cp:].astype(id_ref.dtype)


# ------------------------------ kernel wrappers ----------------------------- #

def _pick_tm(M, tm):
    # bf16 A -> 16 rows per sublane-packed vreg; round the row tile to 16.
    return max(16, min(tm, _round_up(M, 16)))


def _fused_conv(a, w_pad, shift_pad, *, residual=None, relu, out_dtype,
                tm=2048):
    """Row-tiled  epilogue(A @ W + shift [+ residual]).

    a:         (M, Kp)   bf16 im2col rows, Kp a multiple of 128
    w_pad:     (Kp, Cp)  bf16, BN scale folded, zero-padded columns
    shift_pad: (1, Cp)   f32 BN shift (zero in padded columns)
    residual:  (M, Cp)   optional residual (bf16 or f32), added before ReLU
    """
    M, Kp = a.shape
    Cp = w_pad.shape[1]
    tm = _pick_tm(M, tm)
    grid = (pl.cdiv(M, tm),)

    in_specs = [
        pl.BlockSpec((tm, Kp), lambda i: (i, 0)),   # streamed A rows
        pl.BlockSpec((Kp, Cp), lambda i: (0, 0)),   # resident weights
        pl.BlockSpec((1, Cp), lambda i: (0, 0)),    # resident shift
    ]
    inputs = [a, w_pad, shift_pad]
    if residual is not None:
        in_specs.append(pl.BlockSpec((tm, Cp), lambda i: (i, 0)))
        inputs.append(residual)
        kernel = functools.partial(_conv_res_kernel, relu=relu)
    else:
        kernel = functools.partial(_conv_kernel, relu=relu)

    return pl.pallas_call(
        kernel,
        out_shape=jax.ShapeDtypeStruct((M, Cp), out_dtype),
        grid=grid,
        in_specs=in_specs,
        out_specs=pl.BlockSpec((tm, Cp), lambda i: (i, 0)),
        compiler_params=_COMPILER_PARAMS,
    )(*inputs)


def _fused_conv1_ds(a, w_comb, shift_comb, cp, *, tm=2048):
    """conv1(+bn1,relu) and the fused downsample(+bn_ds) in one matmul.

    Returns (out1, identity), both (M, cp) bf16, lane-padded to cp columns.
    """
    M, Kp = a.shape
    C2 = w_comb.shape[1]          # == 2 * cp
    tm = _pick_tm(M, tm)
    grid = (pl.cdiv(M, tm),)

    out_spec = pl.BlockSpec((tm, cp), lambda i: (i, 0))
    return pl.pallas_call(
        _conv1_ds_kernel,
        out_shape=(jax.ShapeDtypeStruct((M, cp), jnp.bfloat16),
                   jax.ShapeDtypeStruct((M, cp), jnp.bfloat16)),
        grid=grid,
        in_specs=[
            pl.BlockSpec((tm, Kp), lambda i: (i, 0)),
            pl.BlockSpec((Kp, C2), lambda i: (0, 0)),
            pl.BlockSpec((1, C2), lambda i: (0, 0)),
        ],
        out_specs=(out_spec, out_spec),
        compiler_params=_COMPILER_PARAMS,
    )(a, w_comb, shift_comb)


# ----------------------------- JAX glue (im2col) ---------------------------- #

def _im2col_3x3_multi(srcs, stride, dtype=jnp.bfloat16):
    """3x3 / padding=1 / given-stride im2col over the *channel concatenation*
    of `srcs` (without materializing the concatenated tensor).

    Column order is (ky, kx, source, channel) -- matching `_w3x3_to_mat` when
    the PyTorch weight's Cin axis is the concat of the same sources in the same
    order.  The K padding to a 128 multiple is folded into the same concat (one
    zero column block), so no separate pad pass over the big A matrix is run.

    Returns (A[M, Kp] in `dtype`, (N, H_out, W_out), K_true).
    """
    N, H, W, _ = srcs[0].shape
    H_out = (H + 2 - 3) // stride + 1
    W_out = (W + 2 - 3) // stride + 1
    padded = [jnp.pad(s.astype(dtype), ((0, 0), (1, 1), (1, 1), (0, 0)))
              for s in srcs]
    cols = []
    for ky in range(3):
        for kx in range(3):
            for sp in padded:
                cols.append(sp[:, ky:ky + (H_out - 1) * stride + 1:stride,
                                  kx:kx + (W_out - 1) * stride + 1:stride, :])
    K = 9 * sum(s.shape[-1] for s in srcs)
    Kp = _round_up(K, 128)
    if Kp > K:
        cols.append(jnp.zeros((N, H_out, W_out, Kp - K), dtype))
    a = jnp.concatenate(cols, axis=-1)                  # (N, H_out, W_out, Kp)
    return a.reshape(N * H_out * W_out, Kp), (N, H_out, W_out), K


def _w3x3_to_mat(w_oihw):
    # (Cout, Cin, 3, 3) -> (9*Cin, Cout), (ky, kx, Cin)-major row order.
    cout = w_oihw.shape[0]
    return jnp.transpose(w_oihw, (2, 3, 1, 0)).reshape(-1, cout)


def _bn_fold(gamma, beta, mean, var, eps=1e-5):
    scale = gamma / jnp.sqrt(var + eps)
    shift = beta - mean * scale
    return scale, shift


# --------------------------- EncoderBlock forward --------------------------- #

def encoder_block_forward(params, x, g1, g2, stride, *, tm=2048):
    """x: (N, inplanes, H, W); g1: (N, geo, H, W); g2: (N, geo, H/stride, W/stride)."""
    planes = params["conv1_w"].shape[0]
    inplanes = x.shape[1]
    cin1 = inplanes + g1.shape[1]
    Cp = _round_up(planes, 128)

    x_nhwc = jnp.transpose(x, (0, 2, 3, 1))
    g1_nhwc = jnp.transpose(g1, (0, 2, 3, 1))
    g2_nhwc = jnp.transpose(g2, (0, 2, 3, 1))

    # conv1 rows: im2col over cat(x, g1) without materializing the concat.
    a1, (N, H1, W1), K1 = _im2col_3x3_multi([x_nhwc, g1_nhwc], stride)
    Kp1 = a1.shape[1]
    s1, b1 = _bn_fold(*params["bn1"])
    w1m = _w3x3_to_mat(params["conv1_w"]) * s1[None, :]       # BN scale folded

    if "ds_w" in params:
        # The 1x1(stride) downsample reads exactly the centre tap (ky=1,kx=1)
        # of conv1's im2col rows -> fuse it as extra output columns.
        sds, bds = _bn_fold(*params["bn_ds"])
        wds = jnp.transpose(params["ds_w"][:, :, 0, 0], (1, 0)) * sds[None, :]
        w_comb = jnp.zeros((Kp1, 2 * Cp), jnp.float32)
        w_comb = w_comb.at[:K1, :planes].set(w1m)
        w_comb = w_comb.at[4 * cin1:5 * cin1, Cp:Cp + planes].set(wds)
        shift_comb = jnp.zeros((1, 2 * Cp), jnp.float32)
        shift_comb = shift_comb.at[0, :planes].set(b1)
        shift_comb = shift_comb.at[0, Cp:Cp + planes].set(bds)
        out1, identity = _fused_conv1_ds(
            a1, w_comb.astype(jnp.bfloat16), shift_comb, Cp, tm=tm)
        # identity stays lane-padded (M, Cp) bf16 and feeds conv2 directly.
    else:
        # PyTorch only skips the downsample when stride==1 and inplanes==planes.
        assert stride == 1 and inplanes == planes, (
            "no-downsample path requires stride==1 and inplanes==planes")
        w1p = jnp.zeros((Kp1, Cp), jnp.float32).at[:K1, :planes].set(w1m)
        sh1 = jnp.zeros((1, Cp), jnp.float32).at[0, :planes].set(b1)
        out1 = _fused_conv(a1, w1p.astype(jnp.bfloat16), sh1,
                           relu=True, out_dtype=jnp.bfloat16, tm=tm)
        identity = jnp.zeros((N * H1 * W1, Cp), jnp.float32)
        identity = identity.at[:, :planes].set(x_nhwc.reshape(-1, planes))

    out1_nhwc = out1[:, :planes].reshape(N, H1, W1, planes)    # bf16

    # conv2 on cat(g2, out1) + bn2 + residual + relu — fused Pallas kernel.
    # TODO(synk): an in-kernel halo-tile gather would avoid re-reading out1 9x.
    a2, _, K2 = _im2col_3x3_multi([g2_nhwc, out1_nhwc], 1)
    Kp2 = a2.shape[1]
    s2, b2 = _bn_fold(*params["bn2"])
    w2m = _w3x3_to_mat(params["conv2_w"]) * s2[None, :]
    w2p = jnp.zeros((Kp2, Cp), jnp.float32).at[:K2, :planes].set(w2m)
    sh2 = jnp.zeros((1, Cp), jnp.float32).at[0, :planes].set(b2)
    out = _fused_conv(a2, w2p.astype(jnp.bfloat16), sh2, residual=identity,
                      relu=True, out_dtype=jnp.float32, tm=tm)

    out_nhwc = out[:, :planes].reshape(N, H1, W1, planes)
    return jnp.transpose(out_nhwc, (0, 3, 1, 2))               # back to NCHW


# ------------------------------ pure-JAX reference -------------------------- #

def reference_forward(params, x, g1, g2, stride):
    def conv(z, w, s, pad):
        return lax.conv_general_dilated(
            z, w, (s, s), [(pad, pad), (pad, pad)],
            dimension_numbers=("NCHW", "OIHW", "NCHW"))

    def bn(z, p):
        gamma, beta, mean, var = p
        sc = gamma / jnp.sqrt(var + 1e-5)
        return z * sc[None, :, None, None] + (beta - mean * sc)[None, :, None, None]

    xc = jnp.concatenate([x, g1], axis=1)
    out = jax.nn.relu(bn(conv(xc, params["conv1_w"], stride, 1), params["bn1"]))
    out = jnp.concatenate([g2, out], axis=1)
    out = bn(conv(out, params["conv2_w"], 1, 1), params["bn2"])
    if "ds_w" in params:
        identity = bn(conv(xc, params["ds_w"], stride, 0), params["bn_ds"])
    else:
        identity = x
    return jax.nn.relu(out + identity)


# ----------------------------------- main ----------------------------------- #

if __name__ == "__main__":
    N, inplanes, planes, geoplanes = 2, 4, 8, 3
    H = W = 16
    stride = 2           # -> downsample branch (conv1x1 + bn) is active

    key = jax.random.PRNGKey(0)
    keys = jax.random.split(key, 16)

    def bn_params(k):
        k1, k2, k3, k4 = jax.random.split(k, 4)
        gamma = 1.0 + 0.1 * jax.random.normal(k1, (planes,), jnp.float32)
        beta = 0.1 * jax.random.normal(k2, (planes,), jnp.float32)
        mean = 0.1 * jax.random.normal(k3, (planes,), jnp.float32)
        var = jax.random.uniform(k4, (planes,), jnp.float32, 0.5, 1.5)
        return (gamma, beta, mean, var)

    params = {
        "conv1_w": 0.1 * jax.random.normal(keys[0], (planes, inplanes + geoplanes, 3, 3), jnp.float32),
        "conv2_w": 0.1 * jax.random.normal(keys[1], (planes, planes + geoplanes, 3, 3), jnp.float32),
        "ds_w":    0.1 * jax.random.normal(keys[2], (planes, inplanes + geoplanes, 1, 1), jnp.float32),
        "bn1": bn_params(keys[3]),
        "bn2": bn_params(keys[4]),
        "bn_ds": bn_params(keys[5]),
    }

    x = jax.random.normal(keys[6], (N, inplanes, H, W), jnp.float32)
    g1 = jax.random.normal(keys[7], (N, geoplanes, H, W), jnp.float32)
    g2 = jax.random.normal(keys[8], (N, geoplanes, H // stride, W // stride), jnp.float32)

    fwd = jax.jit(functools.partial(encoder_block_forward, stride=stride))
    out = jax.block_until_ready(fwd(params, x, g1, g2))

    ref = jax.block_until_ready(reference_forward(params, x, g1, g2, stride))
    # bf16 MXU operands AND bf16 intermediate slabs (out1 / identity);
    # accumulation + epilogue in f32 -> loosened tolerance.
    np.testing.assert_allclose(np.asarray(out), np.asarray(ref), rtol=3e-2, atol=3e-2)

    print("KERNEL_OK")
</pallas_src>

<mosaic_0001>
module attributes {stable_mosaic.version = 11 : i64} {
  func.func @_conv1_ds_kernel(%arg0: i32, %arg1: memref<128x128xbf16, #tpu.memory_space<vmem>>, %arg2: memref<128x256xbf16, #tpu.memory_space<vmem>>, %arg3: memref<1x256xf32, #tpu.memory_space<vmem>>, %arg4: memref<128x128xbf16, #tpu.memory_space<vmem>>, %arg5: memref<128x128xbf16, #tpu.memory_space<vmem>>) attributes {dimension_semantics = [#tpu.dimension_semantics<parallel>], iteration_bounds = array<i64: 1>, scalar_prefetch = 0 : i64, scratch_operands = 0 : i64, tpu.core_type = #tpu.core_type<tc>, window_params = [{transform_indices = @transform_0, window_bounds = array<i64: 128, 128>}, {pipeline_mode = #tpu.pipeline_mode<synchronous>, transform_indices = @transform_1, window_bounds = array<i64: 128, 256>}, {pipeline_mode = #tpu.pipeline_mode<synchronous>, transform_indices = @transform_2, window_bounds = array<i64: 1, 256>}, {transform_indices = @transform_3, window_bounds = array<i64: 128, 128>}, {transform_indices = @transform_4, window_bounds = array<i64: 128, 128>}]} {
    %c0 = arith.constant 0 : index
    %c0_0 = arith.constant 0 : index
    %0 = vector.load %arg1[%c0, %c0_0] : memref<128x128xbf16, #tpu.memory_space<vmem>>, vector<128x128xbf16>
    %c0_1 = arith.constant 0 : index
    %c0_2 = arith.constant 0 : index
    %1 = vector.load %arg2[%c0_1, %c0_2] : memref<128x256xbf16, #tpu.memory_space<vmem>>, vector<128x256xbf16>
    %cst = arith.constant dense<0.000000e+00> : vector<128x256xf32>
    %2 = tpu.matmul %0, %1, %cst {dimension_numbers = #tpu.dot_dimension_numbers<[1], [0], [0], [1], [0, 0, 1, 1], [], []>} : vector<128x128xbf16>, vector<128x256xbf16>, vector<128x256xf32> -> vector<128x256xf32>
    %c0_3 = arith.constant 0 : index
    %c0_4 = arith.constant 0 : index
    %3 = vector.load %arg3[%c0_3, %c0_4] : memref<1x256xf32, #tpu.memory_space<vmem>>, vector<1x256xf32>
    %4 = vector.broadcast %3 : vector<1x256xf32> to vector<128x256xf32>
    %5 = arith.addf %2, %4 : vector<128x256xf32>
    %6 = vector.extract_strided_slice %5 {offsets = [0, 0], sizes = [128, 128], strides = [1, 1]} : vector<128x256xf32> to vector<128x128xf32>
    %cst_5 = arith.constant 0.000000e+00 : f32
    %7 = vector.broadcast %cst_5 : f32 to vector<128x128xf32>
    %8 = arith.maximumf %6, %7 : vector<128x128xf32>
    %9 = arith.truncf %8 : vector<128x128xf32> to vector<128x128xbf16>
    %c0_6 = arith.constant 0 : index
    %c0_7 = arith.constant 0 : index
    %10 = vector.load %arg4[%c0_6, %c0_7] : memref<128x128xbf16, #tpu.memory_space<vmem>>, vector<128x128xbf16>
    tpu.vector_store %arg4[%c0_6, %c0_7], %9 {strides = array<i32>} : memref<128x128xbf16, #tpu.memory_space<vmem>>, vector<128x128xbf16>,
    %11 = vector.extract_strided_slice %5 {offsets = [0, 128], sizes = [128, 128], strides = [1, 1]} : vector<128x256xf32> to vector<128x128xf32>
    %12 = arith.truncf %11 : vector<128x128xf32> to vector<128x128xbf16>
    %c0_8 = arith.constant 0 : index
    %c0_9 = arith.constant 0 : index
    %13 = vector.load %arg5[%c0_8, %c0_9] : memref<128x128xbf16, #tpu.memory_space<vmem>>, vector<128x128xbf16>
    tpu.vector_store %arg5[%c0_8, %c0_9], %12 {strides = array<i32>} : memref<128x128xbf16, #tpu.memory_space<vmem>>, vector<128x128xbf16>,
    return
  }
  func.func @transform_0(%arg0: i32) -> (i32, i32) {
    %c0_i32 = arith.constant 0 : i32
    %c0_i32_0 = arith.constant 0 : i32
    return %arg0, %c0_i32 : i32, i32
  }
  func.func @transform_1(%arg0: i32) -> (i32, i32) {
    %c0_i32 = arith.constant 0 : i32
    %c0_i32_0 = arith.constant 0 : i32
    %c0_i32_1 = arith.constant 0 : i32
    return %c0_i32, %c0_i32_0 : i32, i32
  }
  func.func @transform_2(%arg0: i32) -> (i32, i32) {
    %c0_i32 = arith.constant 0 : i32
    %c0_i32_0 = arith.constant 0 : i32
    %c0_i32_1 = arith.constant 0 : i32
    return %c0_i32, %c0_i32_0 : i32, i32
  }
  func.func @transform_3(%arg0: i32) -> (i32, i32) {
    %c0_i32 = arith.constant 0 : i32
    %c0_i32_0 = arith.constant 0 : i32
    return %arg0, %c0_i32 : i32, i32
  }
  func.func @transform_4(%arg0: i32) -> (i32, i32) {
    %c0_i32 = arith.constant 0 : i32
    %c0_i32_0 = arith.constant 0 : i32
    return %arg0, %c0_i32 : i32, i32
  }
}

module attributes {stable_mosaic.version = 11 : i64} {
  func.func @_conv_res_kernel(%arg0: i32, %arg1: memref<128x128xbf16, #tpu.memory_space<vmem>>, %arg2: memref<128x128xbf16, #tpu.memory_space<vmem>>, %arg3: memref<1x128xf32, #tpu.memory_space<vmem>>, %arg4: memref<128x128xbf16, #tpu.memory_space<vmem>>, %arg5: memref<128x128xf32, #tpu.memory_space<vmem>>) attributes {dimension_semantics = [#tpu.dimension_semantics<parallel>], iteration_bounds = array<i64: 1>, scalar_prefetch = 0 : i64, scratch_operands = 0 : i64, tpu.core_type = #tpu.core_type<tc>, window_params = [{transform_indices = @transform_0, window_bounds = array<i64: 128, 128>}, {pipeline_mode = #tpu.pipeline_mode<synchronous>, transform_indices = @transform_1, window_bounds = array<i64: 128, 128>}, {pipeline_mode = #tpu.pipeline_mode<synchronous>, transform_indices = @transform_2, window_bounds = array<i64: 1, 128>}, {transform_indices = @transform_3, window_bounds = array<i64: 128, 128>}, {transform_indices = @transform_4, window_bounds = array<i64: 128, 128>}]} {
    %c0 = arith.constant 0 : index
    %c0_0 = arith.constant 0 : index
    %0 = vector.load %arg1[%c0, %c0_0] : memref<128x128xbf16, #tpu.memory_space<vmem>>, vector<128x128xbf16>
    %c0_1 = arith.constant 0 : index
    %c0_2 = arith.constant 0 : index
    %1 = vector.load %arg2[%c0_1, %c0_2] : memref<128x128xbf16, #tpu.memory_space<vmem>>, vector<128x128xbf16>
    %cst = arith.constant dense<0.000000e+00> : vector<128x128xf32>
    %2 = tpu.matmul %0, %1, %cst {dimension_numbers = #tpu.dot_dimension_numbers<[1], [0], [0], [1], [0, 0, 1, 1], [], []>} : vector<128x128xbf16>, vector<128x128xbf16>, vector<128x128xf32> -> vector<128x128xf32>
    %c0_3 = arith.constant 0 : index
    %c0_4 = arith.constant 0 : index
    %3 = vector.load %arg3[%c0_3, %c0_4] : memref<1x128xf32, #tpu.memory_space<vmem>>, vector<1x128xf32>
    %4 = vector.broadcast %3 : vector<1x128xf32> to vector<128x128xf32>
    %5 = arith.addf %2, %4 : vector<128x128xf32>
    %c0_5 = arith.constant 0 : index
    %c0_6 = arith.constant 0 : index
    %6 = vector.load %arg4[%c0_5, %c0_6] : memref<128x128xbf16, #tpu.memory_space<vmem>>, vector<128x128xbf16>
    %7 = arith.extf %6 : vector<128x128xbf16> to vector<128x128xf32>
    %8 = arith.addf %5, %7 : vector<128x128xf32>
    %cst_7 = arith.constant 0.000000e+00 : f32
    %9 = vector.broadcast %cst_7 : f32 to vector<128x128xf32>
    %10 = arith.maximumf %8, %9 : vector<128x128xf32>
    %c0_8 = arith.constant 0 : index
    %c0_9 = arith.constant 0 : index
    %11 = vector.load %arg5[%c0_8, %c0_9] : memref<128x128xf32, #tpu.memory_space<vmem>>, vector<128x128xf32>
    tpu.vector_store %arg5[%c0_8, %c0_9], %10 {strides = array<i32>} : memref<128x128xf32, #tpu.memory_space<vmem>>, vector<128x128xf32>,
    return
  }
  func.func @transform_0(%arg0: i32) -> (i32, i32) {
    %c0_i32 = arith.constant 0 : i32
    %c0_i32_0 = arith.constant 0 : i32
    return %arg0, %c0_i32 : i32, i32
  }
  func.func @transform_1(%arg0: i32) -> (i32, i32) {
    %c0_i32 = arith.constant 0 : i32
    %c0_i32_0 = arith.constant 0 : i32
    %c0_i32_1 = arith.constant 0 : i32
    return %c0_i32, %c0_i32_0 : i32, i32
  }
  func.func @transform_2(%arg0: i32) -> (i32, i32) {
    %c0_i32 = arith.constant 0 : i32
    %c0_i32_0 = arith.constant 0 : i32
    %c0_i32_1 = arith.constant 0 : i32
    return %c0_i32, %c0_i32_0 : i32, i32
  }
  func.func @transform_3(%arg0: i32) -> (i32, i32) {
    %c0_i32 = arith.constant 0 : i32
    %c0_i32_0 = arith.constant 0 : i32
    return %arg0, %c0_i32 : i32, i32
  }
  func.func @transform_4(%arg0: i32) -> (i32, i32) {
    %c0_i32 = arith.constant 0 : i32
    %c0_i32_0 = arith.constant 0 : i32
    return %arg0, %c0_i32 : i32, i32
  }
}

</mosaic_0001>

<bundles_post_ra>
// kernel: encoder_block_forward.2
= control target key start
LH: loop header
LB: loop body
LE: loop exit
PB: predicated region body
PF: predicated region fallthrough
CT: control target
= control target key end

     0   :  { %s830_s1 = inlined_call_operand.vmem [shape: bf16[128,256], index: 1, kind: input, shape index: {}]   ;;  %s831_s0 = inlined_call_operand.vmem [shape: bf16[128,128], index: 0, kind: input, shape index: {}]   ;;  %s832_s2 = inlined_call_operand.vmem [shape: f32[1,256], index: 2, kind: input, shape index: {}]   ;;  %s833_s4 = inlined_call_operand.vmem [shape: bf16[128,128], index: 4, kind: output, shape index: {1}]   ;;  %s834_s3 = inlined_call_operand.vmem [shape: bf16[128,128], index: 3, kind: output, shape index: {0}]  }
   0x1   :  { %v458_v0 = vld [vmem:[%s830_s1 + $0x70] sm:$0xf]  ;;  %v487_v1 = vld [vmem:[%s830_s1 + $0x74] sm:$0xf0]  ;;  %v486_v2 = vld [vmem:[%s830_s1 + $0x74] sm:$0xf] }
   0x2   :  { %v459_v3 = vor.u32 %v487_v1, %v458_v0  ;;  %v460_v4 = vld [vmem:[%s830_s1 + $0x78] sm:$0xf0]  ;;  %v450_v5 = vld [vmem:[%s830_s1 + $0x60] sm:$0xf]  ;;  %v485_v6 = vld [vmem:[%s830_s1 + $0x64] sm:$0xf0] }
   0x3   :  { %v463_v7 = vor.u32 %v486_v2, %v460_v4  ;;  %v484_v8 = vld [vmem:[%s830_s1 + $0x64] sm:$0xf]  ;;  %v452_v9 = vld [vmem:[%s830_s1 + $0x68] sm:$0xf0]  ;;  %v451_v10 = vor.u32 %v485_v6, %v450_v5  ;;  %v442_v12 = vld [vmem:[%s830_s1 + $0x50] sm:$0xf] }
   0x4   :  { %182 = vmatpush.bf16.msra.mxu0 %v459_v3  ;;  %582 = vmatpush.bf16.msra.mxu2 %v459_v3  ;;  %v455_v11 = vor.u32 %v484_v8, %v452_v9  ;;  %v483_v13 = vld [vmem:[%s830_s1 + $0x54] sm:$0xf0]  ;;  %v482_v14 = vld [vmem:[%s830_s1 + $0x54] sm:$0xf]  ;;  %v444_v15 = vld [vmem:[%s830_s1 + $0x58] sm:$0xf0] }
   0x5   :  { %231 = vmatpush.bf16.msra.mxu1 %v463_v7  ;;  %590 = vmatpush.bf16.msra.mxu3 %v463_v7  ;;  %v443_v16 = vor.u32 %v483_v13, %v442_v12  ;;  %v447_v17 = vor.u32 %v482_v14, %v444_v15  ;;  %v434_v18 = vld [vmem:[%s830_s1 + $0x40] sm:$0xf]  ;;  %v481_v19 = vld [vmem:[%s830_s1 + $0x44] sm:$0xf0]  ;;  %v480_v20 = vld [vmem:[%s830_s1 + $0x44] sm:$0xf] }
   0x6   :  { %v436_v21 = vld [vmem:[%s830_s1 + $0x48] sm:$0xf0]  ;;  %v435_v22 = vor.u32 %v481_v19, %v434_v18  ;;  %v426_v24 = vld [vmem:[%s830_s1 + $0x30] sm:$0xf]  ;;  %v479_v25 = vld [vmem:[%s830_s1 + $0x34] sm:$0xf0] }
   0x7   :  { %v439_v23 = vor.u32 %v480_v20, %v436_v21  ;;  %v478_v26 = vld [vmem:[%s830_s1 + $0x34] sm:$0xf]  ;;  %v428_v27 = vld [vmem:[%s830_s1 + $0x38] sm:$0xf0]  ;;  %v427_v28 = vor.u32 %v479_v25, %v426_v24  ;;  %v418_v30 = vld [vmem:[%s830_s1 + $0x20] sm:$0xf] }
   0x8   :  { %183 = vmatpush.bf16.msra.mxu0 %v451_v10  ;;  %583 = vmatpush.bf16.msra.mxu2 %v451_v10  ;;  %v431_v29 = vor.u32 %v478_v26, %v428_v27  ;;  %v477_v31 = vld [vmem:[%s830_s1 + $0x24] sm:$0xf0]  ;;  %v476_v32 = vld [vmem:[%s830_s1 + $0x24] sm:$0xf]  ;;  %v420_v33 = vld [vmem:[%s830_s1 + $0x28] sm:$0xf0] }
   0x9   :  { %232 = vmatpush.bf16.msra.mxu1 %v455_v11  ;;  %591 = vmatpush.bf16.msra.mxu3 %v455_v11  ;;  %v419_v34 = vor.u32 %v477_v31, %v418_v30  ;;  %v423_v35 = vor.u32 %v476_v32, %v420_v33  ;;  %v410_v36 = vld [vmem:[%s830_s1 + $0x10] sm:$0xf]  ;;  %v475_v37 = vld [vmem:[%s830_s1 + $0x14] sm:$0xf0]  ;;  %v474_v38 = vld [vmem:[%s830_s1 + $0x14] sm:$0xf] }
   0xa   :  { %v412_v39 = vld [vmem:[%s830_s1 + $0x18] sm:$0xf0]  ;;  %v411_v40 = vor.u32 %v475_v37, %v410_v36  ;;  %v402_v42 = vld [vmem:[%s830_s1] sm:$0xf]  ;;  %v473_v43 = vld [vmem:[%s830_s1 + $0x4] sm:$0xf0] }
   0xb   :  { %v415_v41 = vor.u32 %v474_v38, %v412_v39  ;;  %v472_v44 = vld [vmem:[%s830_s1 + $0x4] sm:$0xf]  ;;  %v404_v45 = vld [vmem:[%s830_s1 + $0x8] sm:$0xf0]  ;;  %v403_v46 = vor.u32 %v473_v43, %v402_v42  ;;  %v466_v52 = vld [vmem:[%s831_s0 + $0x10] sm:$0xff] }
   0xc   :  { %184 = vmatpush.bf16.msra.mxu0 %v443_v16  ;;  %584 = vmatpush.bf16.msra.mxu2 %v443_v16  ;;  %v407_v47 = vor.u32 %v472_v44, %v404_v45  ;;  %v464_v48 = vld [vmem:[%s831_s0] sm:$0xff]  ;;  %v465_v50 = vld [vmem:[%s831_s0 + $0x8] sm:$0xff]  ;;  %v470_v53 = vld [vmem:[%s831_s0 + $0x30] sm:$0xff] }
   0xd   :  { %233 = vmatpush.bf16.msra.mxu1 %v447_v17  ;;  %592 = vmatpush.bf16.msra.mxu3 %v447_v17  ;;  %v468_v49 = vld [vmem:[%s831_s0 + $0x20] sm:$0xff]  ;;  %v469_v51 = vld [vmem:[%s831_s0 + $0x28] sm:$0xff]  ;;  %v467_v54 = vld [vmem:[%s831_s0 + $0x18] sm:$0xff] }
   0xe   :  { %v471_v55 = vld [vmem:[%s831_s0 + $0x38] sm:$0xff]  ;;  %v48_v56 = vld [vmem:[%s832_s2] sm:$0x3] }
   0xf   :  { %v746_v59 = vperm.slane %v48_v56, 0  ;;  %v748_v60 = vperm.slane %v48_v56, 1 }
  0x10   :  { %185 = vmatpush.bf16.msra.mxu0 %v435_v22  ;;  %585 = vmatpush.bf16.msra.mxu2 %v435_v22 }
  0x11   :  { %234 = vmatpush.bf16.msra.mxu1 %v439_v23  ;;  %593 = vmatpush.bf16.msra.mxu3 %v439_v23 }
  0x14   :  { %186 = vmatpush.bf16.msra.mxu0 %v427_v28  ;;  %586 = vmatpush.bf16.msra.mxu2 %v427_v28 }
  0x15   :  { %235 = vmatpush.bf16.msra.mxu1 %v431_v29  ;;  %594 = vmatpush.bf16.msra.mxu3 %v431_v29 }
  0x18   :  { %187 = vmatpush.bf16.msra.mxu0 %v419_v34  ;;  %587 = vmatpush.bf16.msra.mxu2 %v419_v34 }
  0x19   :  { %236 = vmatpush.bf16.msra.mxu1 %v423_v35  ;;  %595 = vmatpush.bf16.msra.mxu3 %v423_v35 }
  0x1c   :  { %188 = vmatpush.bf16.msra.mxu0 %v411_v40  ;;  %588 = vmatpush.bf16.msra.mxu2 %v411_v40 }
  0x1d   :  { %237 = vmatpush.bf16.msra.mxu1 %v415_v41  ;;  %596 = vmatpush.bf16.msra.mxu3 %v415_v41 }
  0x20   :  { %189 = vmatpush.bf16.msra.mxu0 %v403_v46  ;;  %589 = vmatpush.bf16.msra.mxu2 %v403_v46 }
  0x21   :  { %238 = vmatpush.bf16.msra.mxu1 %v407_v47  ;;  %597 = vmatpush.bf16.msra.mxu3 %v407_v47 }
  0x23   :  { %190 = vmatmul.bf16.vlgmr.msra.gmra.mxu0 %v464_v48  ;;  %210 = vmatmul.bf16.vlgmr.msra.gmra.mxu2 %v468_v49 }
  0x24   :  { %239 = vmatmul.bf16.vlgmr.msra.gmra.mxu1 %v464_v48  ;;  %259 = vmatmul.bf16.vlgmr.msra.gmra.mxu3 %v468_v49 }
  0x33   :  { %195 = vmatmul.bf16.gmra.mxu0 %v465_v50  ;;  %215 = vmatmul.bf16.gmra.mxu2 %v469_v51 }
  0x34   :  { %244 = vmatmul.bf16.gmra.mxu1 %v465_v50  ;;  %264 = vmatmul.bf16.gmra.mxu3 %v469_v51 }
  0x43   :  { %200 = vmatmul.bf16.gmra.mxu0 %v466_v52  ;;  %220 = vmatmul.bf16.gmra.mxu2 %v470_v53 }
  0x44   :  { %249 = vmatmul.bf16.gmra.mxu1 %v466_v52  ;;  %269 = vmatmul.bf16.gmra.mxu3 %v470_v53 }
  0x53   :  { %205 = vmatmul.bf16.gmra.mxu0 %v467_v54  ;;  %225 = vmatmul.bf16.gmra.mxu2 %v471_v55 }
  0x54   :  { %254 = vmatmul.bf16.gmra.mxu1 %v467_v54  ;;  %274 = vmatmul.bf16.gmra.mxu3 %v471_v55 }
  0xa0   :  { %v191_v57 = vpop.f32.mrf.mxu0 }
  0xa1   :  { %v240_v58 = vpop.f32.mrf.mxu1  ;;  %v192_v62 = vadd.f32 %v191_v57, %v746_v59 }
  0xa2   :  { %v241_v0 = vadd.f32 %v240_v58, %v748_v60 }
  0xa3   :  { %v280_v5 = vmax.f32 %v192_v62, 0.0 }
  0xa6   :  { %v211_v61 = vpop.f32.mrf.mxu2 }
  0xa7   :  { %v260_v63 = vpop.f32.mrf.mxu3  ;;  %v212_v8 = vadd.f32 %v211_v61, %v746_v59 }
  0xa8   :  { %v193_v1 = vpop.f32.mrf.mxu0  ;;  %v261_v13 = vadd.f32 %v260_v63, %v748_v60 }
  0xa9   :  { %v194_v2 = vadd.f32 %v193_v1, %v746_v59  ;;  %v242_v3 = vpop.f32.mrf.mxu1  ;;  %v288_v16 = vmax.f32 %v212_v8, 0.0 }
  0xaa   :  { %v243_v4 = vadd.f32 %v242_v3, %v748_v60 }
  0xab   :  { %v281_v6 = vmax.f32 %v194_v2, 0.0 }
  0xac   :  { %v531_v7 = vpack.c.bf16 %v243_v4, %v241_v0 }
  0xad   :  { %v491_v9 = vpack.c.bf16 %v281_v6, %v280_v5 }
  0xae   :  { %532 = vst [vmem:[%s833_s4] sm:$0xff] %v531_v7   ;;  %v213_v10 = vpop.f32.mrf.mxu2 }
  0xaf   :  { %492 = vst [vmem:[%s834_s3] sm:$0xff] %v491_v9   ;;  %v214_v11 = vadd.f32 %v213_v10, %v746_v59  ;;  %v262_v12 = vpop.f32.mrf.mxu3 }
  0xb0   :  { %v263_v14 = vadd.f32 %v262_v12, %v748_v60  ;;  %v196_v15 = vpop.f32.mrf.mxu0 }
  0xb1   :  { %v289_v17 = vmax.f32 %v214_v11, 0.0  ;;  %v245_v18 = vpop.f32.mrf.mxu1  ;;  %v197_v22 = vadd.f32 %v196_v15, %v746_v59 }
  0xb2   :  { %v551_v19 = vpack.c.bf16 %v263_v14, %v261_v13  ;;  %v246_v24 = vadd.f32 %v245_v18, %v748_v60 }
  0xb3   :  { %v511_v20 = vpack.c.bf16 %v289_v17, %v288_v16  ;;  %v282_v29 = vmax.f32 %v197_v22, 0.0 }
  0xb4   :  { %578 = vst [vmem:[%s833_s4 + $0x20] sm:$0xff] %v551_v19  }
  0xb5   :  { %571 = vst [vmem:[%s834_s3 + $0x20] sm:$0xff] %v511_v20  }
  0xb6   :  { %v216_v21 = vpop.f32.mrf.mxu2 }
  0xb7   :  { %v265_v23 = vpop.f32.mrf.mxu3  ;;  %v217_v32 = vadd.f32 %v216_v21, %v746_v59 }
  0xb8   :  { %v198_v25 = vpop.f32.mrf.mxu0  ;;  %v266_v37 = vadd.f32 %v265_v23, %v748_v60 }
  0xb9   :  { %v199_v26 = vadd.f32 %v198_v25, %v746_v59  ;;  %v247_v27 = vpop.f32.mrf.mxu1  ;;  %v290_v40 = vmax.f32 %v217_v32, 0.0 }
  0xba   :  { %v248_v28 = vadd.f32 %v247_v27, %v748_v60 }
  0xbb   :  { %v283_v30 = vmax.f32 %v199_v26, 0.0 }
  0xbc   :  { %v536_v31 = vpack.c.bf16 %v248_v28, %v246_v24 }
  0xbd   :  { %v496_v33 = vpack.c.bf16 %v283_v30, %v282_v29 }
  0xbe   :  { %575 = vst [vmem:[%s833_s4 + $0x8] sm:$0xff] %v536_v31   ;;  %v218_v34 = vpop.f32.mrf.mxu2 }
  0xbf   :  { %568 = vst [vmem:[%s834_s3 + $0x8] sm:$0xff] %v496_v33   ;;  %v219_v35 = vadd.f32 %v218_v34, %v746_v59  ;;  %v267_v36 = vpop.f32.mrf.mxu3 }
  0xc0   :  { %v268_v38 = vadd.f32 %v267_v36, %v748_v60  ;;  %v201_v39 = vpop.f32.mrf.mxu0 }
  0xc1   :  { %v291_v41 = vmax.f32 %v219_v35, 0.0  ;;  %v250_v42 = vpop.f32.mrf.mxu1  ;;  %v202_v46 = vadd.f32 %v201_v39, %v746_v59 }
  0xc2   :  { %v556_v43 = vpack.c.bf16 %v268_v38, %v266_v37  ;;  %v251_v48 = vadd.f32 %v250_v42, %v748_v60 }
  0xc3   :  { %v516_v44 = vpack.c.bf16 %v291_v41, %v290_v40  ;;  %v284_v53 = vmax.f32 %v202_v46, 0.0 }
  0xc4   :  { %579 = vst [vmem:[%s833_s4 + $0x28] sm:$0xff] %v556_v43  }
  0xc5   :  { %572 = vst [vmem:[%s834_s3 + $0x28] sm:$0xff] %v516_v44  }
  0xc6   :  { %v221_v45 = vpop.f32.mrf.mxu2 }
  0xc7   :  { %v270_v47 = vpop.f32.mrf.mxu3  ;;  %v222_v56 = vadd.f32 %v221_v45, %v746_v59 }
  0xc8   :  { %v203_v49 = vpop.f32.mrf.mxu0  ;;  %v271_v63 = vadd.f32 %v270_v47, %v748_v60 }
  0xc9   :  { %v204_v50 = vadd.f32 %v203_v49, %v746_v59  ;;  %v252_v51 = vpop.f32.mrf.mxu1  ;;  %v292_v2 = vmax.f32 %v222_v56, 0.0 }
  0xca   :  { %v253_v52 = vadd.f32 %v252_v51, %v748_v60 }
  0xcb   :  { %v285_v54 = vmax.f32 %v204_v50, 0.0 }
  0xcc   :  { %v541_v55 = vpack.c.bf16 %v253_v52, %v251_v48 }
  0xcd   :  { %v501_v57 = vpack.c.bf16 %v285_v54, %v284_v53 }
  0xce   :  { %576 = vst [vmem:[%s833_s4 + $0x10] sm:$0xff] %v541_v55   ;;  %v223_v58 = vpop.f32.mrf.mxu2 }
  0xcf   :  { %569 = vst [vmem:[%s834_s3 + $0x10] sm:$0xff] %v501_v57   ;;  %v224_v61 = vadd.f32 %v223_v58, %v746_v59  ;;  %v272_v62 = vpop.f32.mrf.mxu3 }
  0xd0   :  { %v273_v0 = vadd.f32 %v272_v62, %v748_v60  ;;  %v206_v1 = vpop.f32.mrf.mxu0 }
  0xd1   :  { %v293_v3 = vmax.f32 %v224_v61, 0.0  ;;  %v255_v4 = vpop.f32.mrf.mxu1  ;;  %v207_v8 = vadd.f32 %v206_v1, %v746_v59 }
  0xd2   :  { %v561_v5 = vpack.c.bf16 %v273_v0, %v271_v63  ;;  %v256_v10 = vadd.f32 %v255_v4, %v748_v60 }
  0xd3   :  { %v521_v6 = vpack.c.bf16 %v293_v3, %v292_v2  ;;  %v286_v15 = vmax.f32 %v207_v8, 0.0 }
  0xd4   :  { %580 = vst [vmem:[%s833_s4 + $0x30] sm:$0xff] %v561_v5  }
  0xd5   :  { %573 = vst [vmem:[%s834_s3 + $0x30] sm:$0xff] %v521_v6  }
  0xd6   :  { %v226_v7 = vpop.f32.mrf.mxu2 }
  0xd7   :  { %v275_v9 = vpop.f32.mrf.mxu3  ;;  %v227_v18 = vadd.f32 %v226_v7, %v746_v59 }
  0xd8   :  { %v208_v11 = vpop.f32.mrf.mxu0  ;;  %v276_v23 = vadd.f32 %v275_v9, %v748_v60 }
  0xd9   :  { %v209_v12 = vadd.f32 %v208_v11, %v746_v59  ;;  %v257_v13 = vpop.f32.mrf.mxu1  ;;  %v294_v25 = vmax.f32 %v227_v18, 0.0 }
  0xda   :  { %v258_v14 = vadd.f32 %v257_v13, %v748_v60 }
  0xdb   :  { %v287_v16 = vmax.f32 %v209_v12, 0.0 }
  0xdc   :  { %v546_v17 = vpack.c.bf16 %v258_v14, %v256_v10 }
  0xdd   :  { %v506_v19 = vpack.c.bf16 %v287_v16, %v286_v15 }
  0xde   :  { %577 = vst [vmem:[%s833_s4 + $0x18] sm:$0xff] %v546_v17   ;;  %v228_v20 = vpop.f32.mrf.mxu2 }
  0xdf   :  { %570 = vst [vmem:[%s834_s3 + $0x18] sm:$0xff] %v506_v19   ;;  %v229_v21 = vadd.f32 %v228_v20, %v746_v59  ;;  %v277_v22 = vpop.f32.mrf.mxu3 }
  0xe0   :  { %v278_v24 = vadd.f32 %v277_v22, %v748_v60 }
  0xe1   :  { %v295_v26 = vmax.f32 %v229_v21, 0.0 }
  0xe2   :  { %v566_v27 = vpack.c.bf16 %v278_v24, %v276_v23 }
  0xe3   :  { %v526_v28 = vpack.c.bf16 %v295_v26, %v294_v25 }
  0xe4   :  { %581 = vst [vmem:[%s833_s4 + $0x38] sm:$0xff] %v566_v27  }
  0xe5   :  { %574 = vst [vmem:[%s834_s3 + $0x38] sm:$0xff] %v526_v28  }

// kernel: encoder_block_forward.3
= control target key start
LH: loop header
LB: loop body
LE: loop exit
PB: predicated region body
PF: predicated region fallthrough
CT: control target
= control target key end

     0   :  { %s592_s1 = inlined_call_operand.vmem [shape: bf16[128,128], index: 1, kind: input, shape index: {}]   ;;  %s593_s2 = inlined_call_operand.vmem [shape: f32[1,128], index: 2, kind: input, shape index: {}]   ;;  %s594_s0 = inlined_call_operand.vmem [shape: bf16[128,128], index: 0, kind: input, shape index: {}]   ;;  %s595_s3 = inlined_call_operand.vmem [shape: bf16[128,128], index: 3, kind: input, shape index: {}]   ;;  %s596_s4 = inlined_call_operand.vmem [shape: f32[128,128], index: 4, kind: output, shape index: {}]  }
   0x1   :  { %v361_v0 = vld [vmem:[%s592_s1 + $0x38] sm:$0xff]  ;;  %v360_v1 = vld [vmem:[%s592_s1 + $0x30] sm:$0xff]  ;;  %v359_v2 = vld [vmem:[%s592_s1 + $0x28] sm:$0xff] }
   0x2   :  { %149 = vmatpush.bf16.msra.mxu0 %v361_v0  ;;  %401 = vmatpush.bf16.msra.mxu1 %v361_v0  ;;  %v358_v3 = vld [vmem:[%s592_s1 + $0x20] sm:$0xff]  ;;  %v357_v4 = vld [vmem:[%s592_s1 + $0x18] sm:$0xff]  ;;  %v356_v5 = vld [vmem:[%s592_s1 + $0x10] sm:$0xff] }
   0x3   :  { %402 = vmatpush.bf16.msra.mxu2 %v361_v0  ;;  %403 = vmatpush.bf16.msra.mxu3 %v361_v0  ;;  %v355_v6 = vld [vmem:[%s592_s1 + $0x8] sm:$0xff]  ;;  %v354_v7 = vld [vmem:[%s592_s1] sm:$0xff]  ;;  %v348_v9 = vld [vmem:[%s594_s0 + $0x10] sm:$0xff] }
   0x4   :  { %v346_v8 = vld [vmem:[%s594_s0] sm:$0xff]  ;;  %v352_v11 = vld [vmem:[%s594_s0 + $0x30] sm:$0xff]  ;;  %v347_v12 = vld [vmem:[%s594_s0 + $0x8] sm:$0xff] }
   0x5   :  { %v350_v10 = vld [vmem:[%s594_s0 + $0x20] sm:$0xff]  ;;  %v349_v13 = vld [vmem:[%s594_s0 + $0x18] sm:$0xff]  ;;  %v351_v14 = vld [vmem:[%s594_s0 + $0x28] sm:$0xff] }
   0x6   :  { %150 = vmatpush.bf16.msra.mxu0 %v360_v1  ;;  %404 = vmatpush.bf16.msra.mxu1 %v360_v1  ;;  %v353_v15 = vld [vmem:[%s594_s0 + $0x38] sm:$0xff]  ;;  %v363_v16 = vld [vmem:[%s595_s3] sm:$0xff]   ;;  %v395_v17 = vld [vmem:[%s595_s3 + $0x10] sm:$0xff]  }
   0x7   :  { %405 = vmatpush.bf16.msra.mxu2 %v360_v1  ;;  %406 = vmatpush.bf16.msra.mxu3 %v360_v1  ;;  %v508_v18 = vld [vmem:[%s593_s2] ss:$0 sm:$0xff]  ;;  %v364_v19 = vunpack.c.l.bf16 %v363_v16  ;;  %v372_v20 = vunpack.c.l.bf16 %v395_v17  ;;  %v399_v28 = vld [vmem:[%s595_s3 + $0x30] sm:$0xff]   ;;  %v365_v35 = vunpack.c.h.bf16 %v363_v16  ;;  %v373_v36 = vunpack.c.h.bf16 %v395_v17  ;;  %v394_v49 = vld [vmem:[%s595_s3 + $0x8] sm:$0xff]  }
   0x8   :  { %v397_v27 = vld [vmem:[%s595_s3 + $0x20] sm:$0xff]   ;;  %v388_v32 = vunpack.c.l.bf16 %v399_v28  ;;  %v396_v50 = vld [vmem:[%s595_s3 + $0x18] sm:$0xff]   ;;  %v389_v54 = vunpack.c.h.bf16 %v399_v28  ;;  %v368_v57 = vunpack.c.l.bf16 %v394_v49 }
   0x9   :  { %v380_v31 = vunpack.c.l.bf16 %v397_v27  ;;  %v381_v53 = vunpack.c.h.bf16 %v397_v27  ;;  %v376_v58 = vunpack.c.l.bf16 %v396_v50  ;;  %v377_v16 = vunpack.c.h.bf16 %v396_v50 }
   0xa   :  { %151 = vmatpush.bf16.msra.mxu0 %v359_v2  ;;  %407 = vmatpush.bf16.msra.mxu1 %v359_v2 }
   0xb   :  { %408 = vmatpush.bf16.msra.mxu2 %v359_v2  ;;  %409 = vmatpush.bf16.msra.mxu3 %v359_v2 }
   0xe   :  { %152 = vmatpush.bf16.msra.mxu0 %v358_v3  ;;  %410 = vmatpush.bf16.msra.mxu1 %v358_v3 }
   0xf   :  { %411 = vmatpush.bf16.msra.mxu2 %v358_v3  ;;  %412 = vmatpush.bf16.msra.mxu3 %v358_v3 }
  0x12   :  { %153 = vmatpush.bf16.msra.mxu0 %v357_v4  ;;  %413 = vmatpush.bf16.msra.mxu1 %v357_v4 }
  0x13   :  { %414 = vmatpush.bf16.msra.mxu2 %v357_v4  ;;  %415 = vmatpush.bf16.msra.mxu3 %v357_v4 }
  0x16   :  { %154 = vmatpush.bf16.msra.mxu0 %v356_v5  ;;  %416 = vmatpush.bf16.msra.mxu1 %v356_v5 }
  0x17   :  { %417 = vmatpush.bf16.msra.mxu2 %v356_v5  ;;  %418 = vmatpush.bf16.msra.mxu3 %v356_v5  ;;  %v398_v5 = vld [vmem:[%s595_s3 + $0x28] sm:$0xff]  }
  0x1a   :  { %155 = vmatpush.bf16.msra.mxu0 %v355_v6  ;;  %419 = vmatpush.bf16.msra.mxu1 %v355_v6 }
  0x1b   :  { %420 = vmatpush.bf16.msra.mxu2 %v355_v6  ;;  %421 = vmatpush.bf16.msra.mxu3 %v355_v6  ;;  %v400_v6 = vld [vmem:[%s595_s3 + $0x38] sm:$0xff]  }
  0x1e   :  { %156 = vmatpush.bf16.msra.mxu0 %v354_v7  ;;  %422 = vmatpush.bf16.msra.mxu1 %v354_v7 }
  0x1f   :  { %423 = vmatpush.bf16.msra.mxu2 %v354_v7  ;;  %424 = vmatpush.bf16.msra.mxu3 %v354_v7 }
  0x21   :  { %157 = vmatmul.bf16.vlgmr.msra.gmra.mxu0 %v346_v8  ;;  %167 = vmatmul.bf16.vlgmr.msra.gmra.mxu1 %v348_v9 }
  0x22   :  { %177 = vmatmul.bf16.vlgmr.msra.gmra.mxu2 %v350_v10  ;;  %187 = vmatmul.bf16.vlgmr.msra.gmra.mxu3 %v352_v11  ;;  %v384_v11 = vunpack.c.l.bf16 %v398_v5 }
  0x31   :  { %162 = vmatmul.bf16.gmra.mxu0 %v347_v12  ;;  %172 = vmatmul.bf16.gmra.mxu1 %v349_v13  ;;  %v392_v12 = vunpack.c.l.bf16 %v400_v6 }
  0x32   :  { %182 = vmatmul.bf16.gmra.mxu2 %v351_v14  ;;  %192 = vmatmul.bf16.gmra.mxu3 %v353_v15  ;;  %v369_v15 = vunpack.c.h.bf16 %v394_v49 }
  0x9e   :  { %v158_v21 = vpop.f32.mrf.mxu0  ;;  %v168_v22 = vpop.f32.mrf.mxu1 }
  0x9f   :  { %v159_v23 = vadd.f32 %v508_v18, %v158_v21  ;;  %v169_v24 = vadd.f32 %v508_v18, %v168_v22 }
  0xa1   :  { %v230_v25 = vadd.f32 %v364_v19, %v159_v23  ;;  %v234_v26 = vadd.f32 %v372_v20, %v169_v24 }
  0xa3   :  { %v246_v29 = vmax.f32 %v230_v25, 0.0  ;;  %v250_v30 = vmax.f32 %v234_v26, 0.0 }
  0xa5   :  { %262 = vst [vmem:[%s596_s4] sm:$0xff] %v246_v29  ;;  %v178_v33 = vpop.f32.mrf.mxu2  ;;  %v188_v34 = vpop.f32.mrf.mxu3 }
  0xa6   :  { %266 = vst [vmem:[%s596_s4 + $0x20] sm:$0xff] %v250_v30  ;;  %v179_v37 = vadd.f32 %v508_v18, %v178_v33  ;;  %v189_v38 = vadd.f32 %v508_v18, %v188_v34  ;;  %v160_v39 = vpop.f32.mrf.mxu0  ;;  %v170_v40 = vpop.f32.mrf.mxu1  ;;  %v393_v33 = vunpack.c.h.bf16 %v400_v6 }
  0xa7   :  { %v161_v41 = vadd.f32 %v508_v18, %v160_v39  ;;  %v171_v42 = vadd.f32 %v508_v18, %v170_v40 }
  0xa8   :  { %v238_v43 = vadd.f32 %v380_v31, %v179_v37  ;;  %v242_v44 = vadd.f32 %v388_v32, %v189_v38  ;;  %v385_v32 = vunpack.c.h.bf16 %v398_v5 }
  0xa9   :  { %v231_v45 = vadd.f32 %v365_v35, %v161_v41  ;;  %v235_v46 = vadd.f32 %v373_v36, %v171_v42 }
  0xaa   :  { %v254_v47 = vmax.f32 %v238_v43, 0.0  ;;  %v258_v48 = vmax.f32 %v242_v44, 0.0 }
  0xab   :  { %v247_v51 = vmax.f32 %v231_v45, 0.0  ;;  %v251_v52 = vmax.f32 %v235_v46, 0.0 }
  0xac   :  { %270 = vst [vmem:[%s596_s4 + $0x40] sm:$0xff] %v254_v47 }
  0xad   :  { %274 = vst [vmem:[%s596_s4 + $0x60] sm:$0xff] %v258_v48  ;;  %v180_v55 = vpop.f32.mrf.mxu2  ;;  %v190_v56 = vpop.f32.mrf.mxu3 }
  0xae   :  { %263 = vst [vmem:[%s596_s4 + $0x8] sm:$0xff] %v247_v51  ;;  %v181_v59 = vadd.f32 %v508_v18, %v180_v55  ;;  %v191_v60 = vadd.f32 %v508_v18, %v190_v56  ;;  %v163_v61 = vpop.f32.mrf.mxu0  ;;  %v173_v62 = vpop.f32.mrf.mxu1 }
  0xaf   :  { %267 = vst [vmem:[%s596_s4 + $0x28] sm:$0xff] %v251_v52  ;;  %v164_v63 = vadd.f32 %v508_v18, %v163_v61  ;;  %v174_v0 = vadd.f32 %v508_v18, %v173_v62 }
  0xb0   :  { %v239_v1 = vadd.f32 %v381_v53, %v181_v59  ;;  %v243_v2 = vadd.f32 %v389_v54, %v191_v60 }
  0xb1   :  { %v232_v3 = vadd.f32 %v368_v57, %v164_v63  ;;  %v236_v4 = vadd.f32 %v376_v58, %v174_v0 }
  0xb2   :  { %v255_v7 = vmax.f32 %v239_v1, 0.0  ;;  %v259_v8 = vmax.f32 %v243_v2, 0.0 }
  0xb3   :  { %v248_v9 = vmax.f32 %v232_v3, 0.0  ;;  %v252_v10 = vmax.f32 %v236_v4, 0.0 }
  0xb4   :  { %271 = vst [vmem:[%s596_s4 + $0x48] sm:$0xff] %v255_v7 }
  0xb5   :  { %275 = vst [vmem:[%s596_s4 + $0x68] sm:$0xff] %v259_v8  ;;  %v183_v13 = vpop.f32.mrf.mxu2  ;;  %v193_v14 = vpop.f32.mrf.mxu3 }
  0xb6   :  { %264 = vst [vmem:[%s596_s4 + $0x10] sm:$0xff] %v248_v9  ;;  %v184_v17 = vadd.f32 %v508_v18, %v183_v13  ;;  %v194_v19 = vadd.f32 %v508_v18, %v193_v14  ;;  %v165_v20 = vpop.f32.mrf.mxu0  ;;  %v175_v21 = vpop.f32.mrf.mxu1 }
  0xb7   :  { %268 = vst [vmem:[%s596_s4 + $0x30] sm:$0xff] %v252_v10  ;;  %v166_v22 = vadd.f32 %v508_v18, %v165_v20  ;;  %v176_v23 = vadd.f32 %v508_v18, %v175_v21 }
  0xb8   :  { %v240_v24 = vadd.f32 %v384_v11, %v184_v17  ;;  %v244_v25 = vadd.f32 %v392_v12, %v194_v19 }
  0xb9   :  { %v233_v26 = vadd.f32 %v369_v15, %v166_v22  ;;  %v237_v27 = vadd.f32 %v377_v16, %v176_v23 }
  0xba   :  { %v256_v28 = vmax.f32 %v240_v24, 0.0  ;;  %v260_v29 = vmax.f32 %v244_v25, 0.0 }
  0xbb   :  { %v249_v30 = vmax.f32 %v233_v26, 0.0  ;;  %v253_v31 = vmax.f32 %v237_v27, 0.0 }
  0xbc   :  { %272 = vst [vmem:[%s596_s4 + $0x50] sm:$0xff] %v256_v28 }
  0xbd   :  { %276 = vst [vmem:[%s596_s4 + $0x70] sm:$0xff] %v260_v29  ;;  %v185_v34 = vpop.f32.mrf.mxu2  ;;  %v195_v35 = vpop.f32.mrf.mxu3 }
  0xbe   :  { %265 = vst [vmem:[%s596_s4 + $0x18] sm:$0xff] %v249_v30  ;;  %v186_v36 = vadd.f32 %v508_v18, %v185_v34  ;;  %v196_v37 = vadd.f32 %v508_v18, %v195_v35 }
  0xbf   :  { %269 = vst [vmem:[%s596_s4 + $0x38] sm:$0xff] %v253_v31 }
  0xc0   :  { %v241_v38 = vadd.f32 %v385_v32, %v186_v36  ;;  %v245_v39 = vadd.f32 %v393_v33, %v196_v37 }
  0xc2   :  { %v257_v40 = vmax.f32 %v241_v38, 0.0  ;;  %v261_v41 = vmax.f32 %v245_v39, 0.0 }
  0xc4   :  { %273 = vst [vmem:[%s596_s4 + $0x58] sm:$0xff] %v257_v40 }
  0xc5   :  { %277 = vst [vmem:[%s596_s4 + $0x78] sm:$0xff] %v261_v41 }

</bundles_post_ra>
